<compile_context>
chip_gen: v6e
topology: v6e:2x2x1
jax: 0.10.0
libtpu: 0.0.40
codegen_flags: <defaults>
</compile_context>

<pallas_src>
import functools

import jax
import jax.numpy as jnp
import numpy as np
from jax import lax
from jax.experimental import pallas as pl
from jax.experimental.pallas import tpu as pltpu


def _round_up(x: int, m: int) -> int:
    return ((x + m - 1) // m) * m


def _ntxent_kernel(*refs, n_valid, block_rows, supervised, threshold, cyclic):
    # refs layout:
    #   supervised:   lab_q (TM,1), lab_k (1,Np), q (TM,Fp), kt (Fp,Np), out (TM,1)
    #   unsupervised: q (TM,Fp), kt (Fp,Np), out (TM,1)
    if supervised:
        lab_q_ref, lab_k_ref, q_ref, kt_ref, out_ref = refs
    else:
        q_ref, kt_ref, out_ref = refs

    i = pl.program_id(0)
    n_pad = kt_ref.shape[1]

    # scaled[r, c] = cos(f_r, f_c) / temperature  (normalization + 1/T already
    # folded into the operands in the wrapper; natural [TM,F]x[F,N] contraction).
    scaled = lax.dot_general(
        q_ref[...], kt_ref[...], (((1,), (0,)), ((), ())),
        preferred_element_type=jnp.float32,
    )  # (TM, Np)

    # Small iotas + broadcasting instead of two full (TM, Np) int32 tiles.
    row_ids = i * block_rows + lax.broadcasted_iota(jnp.int32, (block_rows, 1), 0)
    col_ids = lax.broadcasted_iota(jnp.int32, (1, n_pad), 1)
    col_valid = col_ids < n_valid                                   # (1, Np)
    denom_mask = jnp.logical_and(row_ids != col_ids, col_valid)     # (TM, Np)
    row_valid = row_ids < n_valid                                   # (TM, 1)

    # Stable masked log-sum-exp over keys (masked lanes underflow to 0).
    s_m = jnp.where(denom_mask, scaled, jnp.float32(-1e30))
    m = jnp.max(s_m, axis=-1, keepdims=True)                        # (TM, 1)
    log_z = m + jnp.log(jnp.sum(jnp.exp(s_m - m), axis=-1, keepdims=True))

    if supervised:
        dev = jnp.abs(lab_k_ref[...] - lab_q_ref[...])              # (TM, Np)
        if cyclic:
            dev = jnp.abs((dev > 0.5).astype(jnp.float32) - dev)
        pos_f = jnp.logical_and(dev < threshold, denom_mask).astype(jnp.float32)
        pos_cnt = jnp.sum(pos_f, axis=-1, keepdims=True)            # (TM, 1)
        pos_scaled = jnp.sum(scaled * pos_f, axis=-1, keepdims=True)
        # sum(pair_losses * pos) == sum(scaled*pos) - pos_cnt*log_z (no (TM,Np)
        # pair_losses temporary). Valid rows with zero positives intentionally
        # yield 0/0 = NaN, matching the PyTorch reference; only padded rows are
        # guarded so the select never has to discard a NaN lane.
        cnt_safe = jnp.where(row_valid, pos_cnt, jnp.float32(1.0))
        row_loss = (pos_scaled - pos_cnt * log_z) / cnt_safe
    else:
        # SimCLR pairing: the positive partner of row r is column r ^ 1, and
        # every valid row has exactly one positive -> no count reduce / divide.
        pos_f = jnp.logical_and(col_ids == (row_ids ^ 1), col_valid).astype(jnp.float32)
        pos_scaled = jnp.sum(scaled * pos_f, axis=-1, keepdims=True)
        row_loss = pos_scaled - log_z

    out_ref[...] = jnp.where(row_valid, row_loss, jnp.float32(0.0))


def ntxent_loss(
    features: jax.Array,
    labels: jax.Array | None = None,
    *,
    temperature: float = 0.07,
    threshold: float | None = 0.1,
    cyclic_relative_labels: bool = False,
    block_rows: int = 128,
    matmul_dtype=None,
    eps: float = 1e-8,
) -> jax.Array:
    """Pallas TPU implementation of NTXentLoss.forward.

    features: [2 * batch_size, feature_size]
    labels:   [2 * batch_size] or None
    block_rows: query-row tile; must respect the sublane rule for matmul_dtype
        (multiple of 8 for f32, 16 for bf16, 32 for int8/fp8).
    matmul_dtype: dtype fed to the MXU (defaults to features.dtype). For f32
        inputs, bf16 here roughly quadruples MXU throughput at reduced precision.
    returns:  scalar f32 loss
    """
    n, f = features.shape
    supervised = labels is not None
    if supervised and threshold is None:
        raise ValueError("labels provided but threshold is None (unsupervised mode)")

    if matmul_dtype is None:
        matmul_dtype = features.dtype
    matmul_dtype = np.dtype(matmul_dtype)
    min_sublane = max(8, 32 // matmul_dtype.itemsize)
    if block_rows % min_sublane != 0:
        raise ValueError(
            f"block_rows must be a multiple of {min_sublane} for dtype {matmul_dtype}"
        )

    # --- hoisted preprocessing (memory-bound, done once, not per grid step) ---
    # Cosine-normalize rows; fold 1/temperature into the query operand so the
    # MXU emits scaled similarities directly.
    # NOTE: reference clamps the norm *product* at 1e-8; we clamp each norm at
    # eps, which only differs for near-zero-norm degenerate rows.
    feats32 = features.astype(jnp.float32)
    norm = jnp.sqrt(jnp.sum(feats32 * feats32, axis=-1, keepdims=True))
    feat_hat = feats32 / jnp.maximum(norm, eps)
    q = (feat_hat * jnp.float32(1.0 / temperature)).astype(matmul_dtype)
    kt = feat_hat.T.astype(matmul_dtype)                       # (F, N) pre-transposed

    n_pad = _round_up(n, block_rows)
    f_pad = _round_up(f, 256)     # full 256-deep MXU pass on v6e/v7x, 2x128 on v5e
    q = jnp.pad(q, ((0, n_pad - n), (0, f_pad - f)))
    kt = jnp.pad(kt, ((0, f_pad - f), (0, n_pad - n)))
    num_blocks = n_pad // block_rows

    kernel = functools.partial(
        _ntxent_kernel,
        n_valid=n,
        block_rows=block_rows,
        supervised=supervised,
        threshold=float(threshold) if supervised else 0.0,
        cyclic=bool(cyclic_relative_labels),
    )

    in_specs = []
    args = []
    if supervised:
        lab = jnp.pad(labels.astype(jnp.float32).reshape(-1), (0, n_pad - n))
        in_specs += [
            pl.BlockSpec((block_rows, 1), lambda i: (i, 0)),   # labels for query rows
            pl.BlockSpec((1, n_pad), lambda i: (0, 0)),        # labels for all key cols
        ]
        args += [lab.reshape(n_pad, 1), lab.reshape(1, n_pad)]
    in_specs += [
        pl.BlockSpec((block_rows, f_pad), lambda i: (i, 0)),   # query row tile
        pl.BlockSpec((f_pad, n_pad), lambda i: (0, 0)),        # resident K^T
    ]
    args += [q, kt]

    # VMEM budget: double-buffered K^T + query tiles, labels, plus a generous
    # allowance for the in-kernel (TM, N_pad) f32 temporaries. Never below the
    # 32 MiB default (only raises the scoped limit, e.g. on v5e).
    itemsize = matmul_dtype.itemsize
    est = (2 * f_pad * n_pad * itemsize
           + 2 * block_rows * f_pad * itemsize
           + 4 * (n_pad + block_rows) * 4
           + 10 * block_rows * n_pad * 4
           + (2 << 20))
    vmem_limit = int(min(max(est, 32 * 1024 * 1024), 128 * 1024 * 1024))

    row_losses = pl.pallas_call(
        kernel,
        out_shape=jax.ShapeDtypeStruct((n_pad, 1), jnp.float32),
        grid_spec=pltpu.PrefetchScalarGridSpec(
            num_scalar_prefetch=0,
            grid=(num_blocks,),
            in_specs=in_specs,
            # Each step owns a distinct output block -> no carried state, the
            # row-block axis can be "parallel" (uses both TCs on v7x).
            out_specs=pl.BlockSpec((block_rows, 1), lambda i: (i, 0)),
        ),
        compiler_params=pltpu.CompilerParams(
            dimension_semantics=("parallel",),
            vmem_limit_bytes=vmem_limit,
        ),
    )(*args)

    # Tiny finalization in JAX (padded rows contribute exact zeros).
    return -jnp.sum(row_losses) / jnp.float32(n)


def _ntxent_ref(features, labels=None, temperature=0.07, threshold=0.1, cyclic=False):
    """Pure-JAX reference mirroring the PyTorch module (sanity check)."""
    n = features.shape[0]
    self_mask = 1.0 - jnp.eye(n, dtype=jnp.float32)
    if labels is None:
        pattern = jnp.zeros((n - 1,), dtype=jnp.float32).at[::2].set(1.0)
        pos_mask = jnp.diag(pattern, 1) + jnp.diag(pattern, -1)
    else:
        lab = labels.astype(jnp.float32).reshape(n, 1)
        dev = jnp.abs(lab.T - lab)
        if cyclic:
            dev = jnp.abs((dev > 0.5).astype(jnp.float32) - dev)
        pos_mask = (dev < threshold).astype(jnp.float32) * self_mask
    f = features.astype(jnp.float32)
    sim = f @ f.T
    norm = jnp.sqrt(jnp.sum(f * f, axis=-1, keepdims=True))
    cos = sim / jnp.maximum(norm * norm.T, 1e-8)
    scaled = cos / temperature
    masked_exp = jnp.exp(scaled) * self_mask
    pair_losses = scaled - jnp.log(jnp.sum(masked_exp, axis=1, keepdims=True))
    feat_losses = jnp.sum(pair_losses * pos_mask, axis=1) / jnp.sum(pos_mask, axis=1)
    return -jnp.mean(feat_losses)


if __name__ == "__main__":
    key = jax.random.PRNGKey(0)
    k_feat, k_feat2 = jax.random.split(key)

    # config A: batch_size=8 -> N=16 rows, F=32; block_rows=8 -> 2 grid steps
    #           (exercises per-block output writeback and the F padding to 256).
    n_a, feat_size = 16, 32
    features_a = jax.random.normal(k_feat, (n_a, feat_size), dtype=jnp.float32)
    # evenly spread labels so every row is guaranteed >=1 positive pair.
    labels_a = jnp.linspace(0.0, 1.0, n_a).astype(jnp.float32)

    # config B: batch_size=5 -> N=10 rows, padded to 16 (exercises row padding).
    n_b = 10
    features_b = jax.random.normal(k_feat2, (n_b, feat_size), dtype=jnp.float32)

    # unsupervised (SimCLR-style)
    loss_unsup_a = ntxent_loss(features_a, None, block_rows=8)
    loss_unsup_b = ntxent_loss(features_b, None, block_rows=8)
    # supervised / positional with label threshold, plus cyclic variant
    loss_sup = ntxent_loss(features_a, labels_a, threshold=0.25, block_rows=8)
    loss_cyc = ntxent_loss(features_a, labels_a, threshold=0.25,
                           cyclic_relative_labels=True, block_rows=8)
    jax.block_until_ready((loss_unsup_a, loss_unsup_b, loss_sup, loss_cyc))

    ref_unsup_a = _ntxent_ref(features_a, None)
    ref_unsup_b = _ntxent_ref(features_b, None)
    ref_sup = _ntxent_ref(features_a, labels_a, threshold=0.25)
    ref_cyc = _ntxent_ref(features_a, labels_a, threshold=0.25, cyclic=True)

    assert np.allclose(np.asarray(loss_unsup_a), np.asarray(ref_unsup_a), rtol=1e-4, atol=1e-4)
    assert np.allclose(np.asarray(loss_unsup_b), np.asarray(ref_unsup_b), rtol=1e-4, atol=1e-4)
    assert np.allclose(np.asarray(loss_sup), np.asarray(ref_sup), rtol=1e-4, atol=1e-4)
    assert np.allclose(np.asarray(loss_cyc), np.asarray(ref_cyc), rtol=1e-4, atol=1e-4)

    print("KERNEL_OK")
</pallas_src>

<mosaic_0001>
module attributes {stable_mosaic.version = 11 : i64} {
  func.func @_ntxent_kernel(%arg0: i32, %arg1: memref<8x256xf32, #tpu.memory_space<vmem>>, %arg2: memref<256x16xf32, #tpu.memory_space<vmem>>, %arg3: memref<8x1xf32, #tpu.memory_space<vmem>>) attributes {dimension_semantics = [#tpu.dimension_semantics<parallel>], iteration_bounds = array<i64: 2>, scalar_prefetch = 0 : i64, scratch_operands = 0 : i64, tpu.core_type = #tpu.core_type<tc>, window_params = [{transform_indices = @transform_0, window_bounds = array<i64: 8, 256>}, {pipeline_mode = #tpu.pipeline_mode<synchronous>, transform_indices = @transform_1, window_bounds = array<i64: 256, 16>}, {transform_indices = @transform_2, window_bounds = array<i64: 8, 1>}]} {
    %c0 = arith.constant 0 : index
    %c0_0 = arith.constant 0 : index
    %0 = vector.load %arg1[%c0, %c0_0] : memref<8x256xf32, #tpu.memory_space<vmem>>, vector<8x256xf32>
    %c0_1 = arith.constant 0 : index
    %c0_2 = arith.constant 0 : index
    %1 = vector.load %arg2[%c0_1, %c0_2] : memref<256x16xf32, #tpu.memory_space<vmem>>, vector<256x16xf32>
    %cst = arith.constant dense<0.000000e+00> : vector<8x16xf32>
    %2 = tpu.matmul %0, %1, %cst {dimension_numbers = #tpu.dot_dimension_numbers<[1], [0], [0], [1], [0, 0, 1, 1], [], []>} : vector<8x256xf32>, vector<256x16xf32>, vector<8x16xf32> -> vector<8x16xf32>
    %c8_i32 = arith.constant 8 : i32
    %3 = arith.muli %arg0, %c8_i32 : i32
    %4 = tpu.iota {dimensions = array<i32: 0>} : vector<8x1xi32>
    %5 = vector.broadcast %3 : i32 to vector<8x1xi32>
    %6 = arith.addi %5, %4 : vector<8x1xi32>
    %7 = tpu.iota {dimensions = array<i32: 1>} : vector<1x16xi32>
    %c16_i32 = arith.constant 16 : i32
    %8 = vector.broadcast %c16_i32 : i32 to vector<1x16xi32>
    %9 = arith.cmpi slt, %7, %8 : vector<1x16xi32>
    %10 = vector.broadcast %6 : vector<8x1xi32> to vector<8x16xi32>
    %11 = vector.broadcast %7 : vector<1x16xi32> to vector<8x16xi32>
    %12 = arith.cmpi ne, %10, %11 : vector<8x16xi32>
    %13 = vector.broadcast %9 : vector<1x16xi1> to vector<8x16xi1>
    %14 = arith.andi %12, %13 : vector<8x16xi1>
    %c16_i32_3 = arith.constant 16 : i32
    %15 = vector.broadcast %c16_i32_3 : i32 to vector<8x1xi32>
    %16 = arith.cmpi slt, %6, %15 : vector<8x1xi32>
    %cst_4 = arith.constant -1.000000e+30 : f32
    %17 = vector.broadcast %cst_4 : f32 to vector<8x16xf32>
    %18 = arith.select %14, %2, %17 : vector<8x16xi1>, vector<8x16xf32>
    %cst_5 = arith.constant dense<0xFF800000> : vector<8xf32>
    %19 = vector.multi_reduction <maximumf>, %18, %cst_5 [1] : vector<8x16xf32> to vector<8xf32>
    %20 = vector.shape_cast %19 : vector<8xf32> to vector<8x1xf32>
    %21 = vector.broadcast %20 : vector<8x1xf32> to vector<8x16xf32>
    %22 = arith.subf %18, %21 : vector<8x16xf32>
    %23 = math.exp %22 : vector<8x16xf32>
    %cst_6 = arith.constant dense<0.000000e+00> : vector<8xf32>
    %24 = vector.multi_reduction <add>, %23, %cst_6 [1] : vector<8x16xf32> to vector<8xf32>
    %25 = vector.shape_cast %24 : vector<8xf32> to vector<8x1xf32>
    %26 = math.log %25 : vector<8x1xf32>
    %27 = arith.addf %20, %26 : vector<8x1xf32>
    %c1_i32 = arith.constant 1 : i32
    %28 = vector.broadcast %c1_i32 : i32 to vector<8x1xi32>
    %29 = arith.xori %6, %28 : vector<8x1xi32>
    %30 = vector.broadcast %7 : vector<1x16xi32> to vector<8x16xi32>
    %31 = vector.broadcast %29 : vector<8x1xi32> to vector<8x16xi32>
    %32 = arith.cmpi eq, %30, %31 : vector<8x16xi32>
    %33 = vector.broadcast %9 : vector<1x16xi1> to vector<8x16xi1>
    %34 = arith.andi %32, %33 : vector<8x16xi1>
    %35 = arith.extui %34 : vector<8x16xi1> to vector<8x16xi32>
    %36 = arith.sitofp %35 : vector<8x16xi32> to vector<8x16xf32>
    %37 = arith.mulf %2, %36 : vector<8x16xf32>
    %cst_7 = arith.constant dense<0.000000e+00> : vector<8xf32>
    %38 = vector.multi_reduction <add>, %37, %cst_7 [1] : vector<8x16xf32> to vector<8xf32>
    %39 = vector.shape_cast %38 : vector<8xf32> to vector<8x1xf32>
    %40 = arith.subf %39, %27 : vector<8x1xf32>
    %cst_8 = arith.constant 0.000000e+00 : f32
    %41 = vector.broadcast %cst_8 : f32 to vector<8x1xf32>
    %42 = arith.select %16, %40, %41 : vector<8x1xi1>, vector<8x1xf32>
    %c0_9 = arith.constant 0 : index
    %c0_10 = arith.constant 0 : index
    %43 = vector.load %arg3[%c0_9, %c0_10] : memref<8x1xf32, #tpu.memory_space<vmem>>, vector<8x1xf32>
    tpu.vector_store %arg3[%c0_9, %c0_10], %42 {strides = array<i32>} : memref<8x1xf32, #tpu.memory_space<vmem>>, vector<8x1xf32>,
    return
  }
  func.func @transform_0(%arg0: i32) -> (i32, i32) {
    %c0_i32 = arith.constant 0 : i32
    %c0_i32_0 = arith.constant 0 : i32
    return %arg0, %c0_i32 : i32, i32
  }
  func.func @transform_1(%arg0: i32) -> (i32, i32) {
    %c0_i32 = arith.constant 0 : i32
    %c0_i32_0 = arith.constant 0 : i32
    %c0_i32_1 = arith.constant 0 : i32
    return %c0_i32, %c0_i32_0 : i32, i32
  }
  func.func @transform_2(%arg0: i32) -> (i32, i32) {
    %c0_i32 = arith.constant 0 : i32
    %c0_i32_0 = arith.constant 0 : i32
    return %arg0, %c0_i32 : i32, i32
  }
}

</mosaic_0001>

<bundles_post_ra>
// kernel: tpu_custom_call.1
= control target key start
LH: loop header
LB: loop body
LE: loop exit
PB: predicated region body
PF: predicated region fallthrough
CT: control target
= control target key end

     0   :  { %s424_s9 = smov 0   ;;  %s550_s0 = inlined_call_operand.vmem [shape: f32[16,256], index: 0, kind: input, shape index: {}]   ;;  %s551_s1 = inlined_call_operand.vmem [shape: f32[256,16], index: 1, kind: input, shape index: {}]   ;;  %s552_s2 = inlined_call_operand.vmem [shape: f32[16,1], index: 2, kind: output, shape index: {}]  }
   0x1 LB: > { %s430_s10 = sadd.s32 4294967295, %s406_s9   ;;  %p343_p0 = scmp.ge.s32.totalorder %s406_s9, 1  ;;  %s406_s9 = sphi %s424_s9, %s12_s9  }
   0x2   : > { %p112_p1 = scmp.lt.s32.totalorder %s406_s9, 3 }
   0x4   : > { %p113_p2 = pnand %p343_p0, %p112_p1 }
   0x5   : > { %p133_p3 = scmp.lt.s32.totalorder (!%p113_p2), %s430_s10, 1  ;;  %s347_s3 = sshll.u32 (!%p113_p2), %s430_s10, 3 }
   0x6   : > { %116 = sbr.rel (%p113_p2) target bundleno = 560 (0x230), region = 28 }
   0xb   : > { %v175_v0 = vld [vmem:[%s551_s1 + $0xf8] sm:$0xff]  ;;  %v174_v2 = vld [vmem:[%s551_s1 + $0xf0] sm:$0xff]  ;;  %v173_v4 = vld [vmem:[%s551_s1 + $0xe8] sm:$0xff]  ;;  %s451_s21 = scalar_select %p133_p3, %s430_s10, 1  ;;  %v247_v34 = vlaneseq  ;;  %v249_v36 = vstv %s347_s3  ;;  %v408_v42 = vmov 0.0   ;;  %vm260_vm5 = vcmask 130048  }
   0xc   : > { %v159_v1 = vld [vmem:[%s551_s1 + $0x78] sm:$0xff]  ;;  %352 = vmatprep.subr.mxu0 %v175_v0  ;;  %v158_v3 = vld [vmem:[%s551_s1 + $0x70] sm:$0xff]  ;;  %v157_v5 = vld [vmem:[%s551_s1 + $0x68] sm:$0xff]  ;;  %vm284_vm7 = vcmask 7168  }
   0xd   : > { %353 = vmatpush3.msra.mxu0 %v159_v1  ;;  %v172_v6 = vld [vmem:[%s551_s1 + $0xe0] sm:$0xff]  ;;  %s351_s26 = sshll.u32 %s451_s21, 4  ;;  %v171_v8 = vld [vmem:[%s551_s1 + $0xd8] sm:$0xff]  ;;  %v170_v10 = vld [vmem:[%s551_s1 + $0xd0] sm:$0xff]  ;;  %v248_v35 = vshrl.u32 %v247_v34, 7  ;;  %v252_v38 = vand.u32 127, %v247_v34 }
   0xe   : > { %354 = vmatprep.subr.mxu0 %v174_v2  ;;  %v156_v7 = vld [vmem:[%s551_s1 + $0x60] sm:$0xff]  ;;  %v155_v9 = vld [vmem:[%s551_s1 + $0x58] sm:$0xff]  ;;  %s472_s7 = scalar_lea.vmem %s550_s0, %s351_s26  ;;  %v154_v11 = vld [vmem:[%s551_s1 + $0x50] sm:$0xff]  ;;  %s346_s10 = sshll.u32 %s451_s21, 3 }
   0xf   : > { %355 = vmatpush3.msra.mxu0 %v158_v3  ;;  %v169_v12 = vld [vmem:[%s551_s1 + $0xc8] sm:$0xff]  ;;  %v168_v15 = vld [vmem:[%s551_s1 + $0xc0] sm:$0xff]  ;;  %v167_v17 = vld [vmem:[%s551_s1 + $0xb8] sm:$0xff]  ;;  %v250_v37 = vadd.s32 %v249_v36, %v248_v35  ;;  %vm253_vm0 = vcmp.lt.s32.totalorder %v252_v38, 16  ;;  %s141_s5 = scalar_lea.vmem %s552_s2, %s346_s10 }
  0x10   : > { %356 = vmatprep.subr.mxu0 %v173_v4  ;;  %v143_v13 = vld [vmem:[%s472_s7 + $0x8] sm:$0xff]  ;;  %v152_v16 = vld [vmem:[%s551_s1 + $0x40] sm:$0xff]  ;;  %v151_v18 = vld [vmem:[%s551_s1 + $0x38] sm:$0xff] }
  0x11   : > { %357 = vmatpush3.msra.mxu0 %v157_v5  ;;  %v153_v14 = vld [vmem:[%s551_s1 + $0x48] sm:$0xff]  ;;  %240 = vmatprep.mubr.f32.mxu0 %v143_v13  ;;  %v166_v19 = vld [vmem:[%s551_s1 + $0xb0] sm:$0xff]  ;;  %v164_v23 = vld [vmem:[%s551_s1 + $0xa0] sm:$0xff]  ;;  %v273_v39 = vxor.u32 1, %v250_v37  ;;  %vm254_vm2 = vcmp.ne.s32.totalorder %v250_v37, %v252_v38  ;;  %vm258_vm6 = vcmp.lt.s32.totalorder %v250_v37, 16 }
  0x12   : > { %358 = vmatprep.subr.mxu0 %v172_v6  ;;  %v150_v20 = vld [vmem:[%s551_s1 + $0x30] sm:$0xff]  ;;  %v165_v21 = vld [vmem:[%s551_s1 + $0xa8] sm:$0xff]  ;;  %v148_v24 = vld [vmem:[%s551_s1 + $0x20] sm:$0xff] }
  0x13   : > { %359 = vmatpush3.msra.mxu0 %v156_v7  ;;  %v149_v22 = vld [vmem:[%s551_s1 + $0x28] sm:$0xff]  ;;  %v163_v25 = vld [vmem:[%s551_s1 + $0x98] sm:$0xff]  ;;  %v162_v27 = vld [vmem:[%s551_s1 + $0x90] sm:$0xff]  ;;  %vm274_vm1 = vcmp.eq.s32.totalorder %v252_v38, %v273_v39 }
  0x14   : > { %360 = vmatprep.subr.mxu0 %v171_v8  ;;  %v147_v26 = vld [vmem:[%s551_s1 + $0x18] sm:$0xff]  ;;  %v146_v28 = vld [vmem:[%s551_s1 + $0x10] sm:$0xff]  ;;  %v161_v29 = vld [vmem:[%s551_s1 + $0x88] sm:$0xff] }
  0x15   : > { %361 = vmatpush3.msra.mxu0 %v155_v9  ;;  %v145_v30 = vld [vmem:[%s551_s1 + $0x8] sm:$0xff]  ;;  %v160_v31 = vld [vmem:[%s551_s1 + $0x80] sm:$0xff]  ;;  %vm275_vm3 = vmand %vm274_vm1, %vm253_vm0 }
  0x16   : > { %362 = vmatprep.subr.mxu0 %v170_v10  ;;  %v144_v32 = vld [vmem:[%s551_s1] sm:$0xff]  ;;  %vm257_vm4 = vmand %vm254_vm2, %vm253_vm0  ;;  %v348_v43 = vsel %vm275_vm3, 1.0, %v408_v42 }
  0x17   : > { %363 = vmatpush3.msra.mxu0 %v154_v11  ;;  %v142_v33 = vld [vmem:[%s472_s7] sm:$0xff] }
  0x18   : > { %364 = vmatprep.subr.mxu0 %v169_v12 }
  0x19   : > { %365 = vmatpush3.msra.mxu0 %v153_v14 }
  0x1a   : > { %366 = vmatprep.subr.mxu0 %v168_v15 }
  0x1b   : > { %367 = vmatpush3.msra.mxu0 %v152_v16 }
  0x1c   : > { %368 = vmatprep.subr.mxu0 %v167_v17 }
  0x1d   : > { %369 = vmatpush3.msra.mxu0 %v151_v18 }
  0x1e   : > { %370 = vmatprep.subr.mxu0 %v166_v19 }
  0x1f   : > { %371 = vmatpush3.msra.mxu0 %v150_v20 }
  0x20   : > { %372 = vmatprep.subr.mxu0 %v165_v21 }
  0x21   : > { %373 = vmatpush3.msra.mxu0 %v149_v22 }
  0x22   : > { %374 = vmatprep.subr.mxu0 %v164_v23 }
  0x23   : > { %375 = vmatpush3.msra.mxu0 %v148_v24 }
  0x24   : > { %376 = vmatprep.subr.mxu0 %v163_v25 }
  0x25   : > { %377 = vmatpush3.msra.mxu0 %v147_v26 }
  0x26   : > { %378 = vmatprep.subr.mxu0 %v162_v27 }
  0x27   : > { %379 = vmatpush3.msra.mxu0 %v146_v28 }
  0x28   : > { %380 = vmatprep.subr.mxu0 %v161_v29 }
  0x29   : > { %381 = vmatpush3.msra.mxu0 %v145_v30 }
  0x2a   : > { %382 = vmatprep.subr.mxu0 %v160_v31 }
  0x2b   : > { %383 = vmatpush3.msra.mxu0 %v144_v32 }
  0x2c   : > { %241 = vmatmul.mubr.f32.vlgmr.msra.gmra.mxu0 %v142_v33 }
  0xec   : > { %v384_v40 = vpop.f32.mrf.mxu0 }
  0xee   : > { %v385_v41 = vpop.f32.mrf.mxu0 }
  0xef   : > { %v386_v44 = vadd.f32 %v385_v41, %v384_v40 }
  0xf1   : > { %v259_v45 = vsel %vm257_vm4, %v386_v44, -1e+30  ;;  %v278_v46 = vmul.f32 %v386_v44, %v348_v43 }
  0xf2   : > { %v261_v47 = vsel %vm260_vm5, %v259_v45, -inf }
  0xf3   : > { %262 = vmax.xlane.f32.xlu0 %v261_v47  ;;  %v279_v48 = vsel %vm260_vm5, %v278_v46, 0.0 }
  0xf4   : > { %280 = vadd.xlane.f32.xlu1 %v279_v48 }
 0x17c   : > { %v263_v49 = vpop.xlane.xlu0 %262 }
 0x17d   : > { %v264_v50 = vsub.f32 %v259_v45, %v263_v49  ;;  %v281_v58 = vpop.xlane.xlu1 %280 }
 0x17f   : > { %v265_v51 = vmul.f32 1.442695, %v264_v50 }
 0x181   : > { %396 = vpow2.f32 %v265_v51 }
 0x18e   : > { %v397_v52 = vpop.eup %396 }
 0x18f   : > { %v267_v53 = vsel %vm260_vm5, %v397_v52, 0.0 }
 0x190   : > { %268 = vadd.xlane.f32.xlu0 %v267_v53 }
 0x219   : > { %v269_v54 = vpop.xlane.xlu0 %268 }
 0x21a   : > { %398 = vlog2.f32 %v269_v54 }
 0x227   : > { %v399_v55 = vpop.eup %398 }
 0x228   : > { %v271_v56 = vmul.f32 0.6931472, %v399_v55 }
 0x22a   : > { %v272_v57 = vadd.f32 %v271_v56, %v263_v49 }
 0x22c   : > { %v282_v59 = vsub.f32 %v281_v58, %v272_v57 }
 0x22e   : > { %v283_v60 = vsel %vm258_vm6, %v282_v59, 0.0 }
 0x22f   : > { %285 = vst.msk [vmem:[%s141_s5] sm:$0xff] %vm284_vm7, %v283_v60 }
 0x230 PF: > { %s12_s9 = sadd.s32 1, %s406_s9  }
 0x231   : > { %p9_p4 = scmp.ge.s32.totalorder %s12_s9, 4  }
 0x233   :  { %11 = sbr.rel (!%p9_p4) target bundleno = 1 (0x1), region = 58 }

</bundles_post_ra>
